<compile_context>
chip_gen: v7x
topology: tpu7x:2x2x1
jax: 0.10.0
libtpu: 0.0.40
codegen_flags: <defaults>
</compile_context>

<pallas_src>
import functools

import jax
import jax.numpy as jnp
from jax.experimental import pallas as pl
from jax.experimental.pallas import tpu as pltpu

EPS = 1e-5  # nn.LayerNorm default eps


def _round_up(x, m):
    return ((x + m - 1) // m) * m


def _pick_tile(n, candidates):
    for c in candidates:
        if n % c == 0:
            return c
    return n


def _pick_tm(n_pad_m, m_align):
    cands = [c for c in (512, 256, 128, 64, 32, 16, 8) if c % m_align == 0]
    # Prefer >= 2 row tiles so the "parallel" axis load-balances across the two
    # v7x TensorCores (no measurable effect on single-TC v5e/v6e).
    for c in cands:
        if n_pad_m % c == 0 and n_pad_m // c >= 2:
            return c
    for c in cands:
        if n_pad_m % c == 0:
            return c
    return n_pad_m


def _pad_rows(n, m_align):
    # Row (M) dim only needs sublane alignment; opportunistically round up to a
    # larger multiple (enables a bigger TM) when the extra padding is <= ~12.5%.
    for a in (256, 128, 64, 32, 16, 8):
        if a % m_align == 0 and a <= n and _round_up(n, a) - n <= max(n // 8, 0):
            return _round_up(n, a)
    return _round_up(n, m_align)


def _vmem_capacity_bytes():
    try:
        return int(pltpu.get_tpu_info().vmem_capacity_bytes)
    except Exception:
        return 64 * 1024 * 1024  # conservative default (v7x per-TC VMEM)


def _layernorm(h, gamma, beta, d_true):
    # Padded feature columns of h are exactly zero (zero-padded x and adj), so
    # un-masked sums over the padded width equal the true-width sums.
    # var = E[h^2] - mean^2 avoids the per-tile iota/select mask; clamp at 0
    # against cancellation.
    inv_d = 1.0 / float(d_true)
    mean = jnp.sum(h, axis=-1, keepdims=True) * inv_d
    var = jnp.maximum(
        jnp.sum(h * h, axis=-1, keepdims=True) * inv_d - mean * mean, 0.0)
    inv_std = jax.lax.rsqrt(var + EPS)
    return (h - mean) * inv_std * gamma + beta


def gnn_kernel_resident(adj_ref, x_ref, gamma_ref, beta_ref, o_ref, acc_ref,
                        *, d_true, tm, tk):
    """adj streamed as (TM, TK) tiles; x fully resident in VMEM."""
    i = pl.program_id(0)
    k = pl.program_id(1)

    @pl.when(k == 0)
    def _():
        # Fold the residual into the accumulator init (saves the zeros store
        # and the epilogue add; xrow slice costs no extra DMA — x is resident).
        r = pl.multiple_of(i * tm, tm)
        acc_ref[...] = x_ref[pl.ds(r, tm), :].astype(jnp.float32)

    c = pl.multiple_of(k * tk, tk)
    acc_ref[...] += jnp.dot(adj_ref[...], x_ref[pl.ds(c, tk), :],
                            preferred_element_type=jnp.float32)

    @pl.when(k == pl.num_programs(1) - 1)
    def _():
        y = _layernorm(acc_ref[...], gamma_ref[...], beta_ref[...], d_true)
        o_ref[...] = y.astype(o_ref.dtype)


def gnn_kernel_streamed(adj_ref, xk_ref, xrow_ref, gamma_ref, beta_ref, o_ref,
                        acc_ref, *, d_true):
    """Fallback when x does not fit in VMEM: x streamed twice (K- and row-tiles)."""
    k = pl.program_id(1)

    @pl.when(k == 0)
    def _():
        acc_ref[...] = xrow_ref[...].astype(jnp.float32)  # residual folded in

    acc_ref[...] += jnp.dot(adj_ref[...], xk_ref[...],
                            preferred_element_type=jnp.float32)

    @pl.when(k == pl.num_programs(1) - 1)
    def _():
        y = _layernorm(acc_ref[...], gamma_ref[...], beta_ref[...], d_true)
        o_ref[...] = y.astype(o_ref.dtype)


def lightweight_gnn(x, adj, gamma, beta, *, compute_dtype=None,
                    force_streamed=False):
    N, D = x.shape
    assert adj.shape == (N, N)

    cdt = jnp.dtype(compute_dtype) if compute_dtype is not None else x.dtype
    itemsize = cdt.itemsize
    m_align = 8 if itemsize >= 4 else 16  # sublane packing per compute dtype

    D_pad = _round_up(D, 128)                       # lane-dense feature dim
    N_pad_k = _round_up(N, 128)                     # contraction / lane dim
    N_pad_m = min(_pad_rows(N, m_align), N_pad_k)   # row dim (sublane-aligned)

    def _prep(a, shape, dtype):
        # Cast first, then pad: one pass, never a padded-f32 temp just to cast.
        if a.dtype != dtype:
            a = a.astype(dtype)
        if a.shape != shape:
            a = jnp.pad(a, tuple((0, s - d) for s, d in zip(shape, a.shape)))
        return a

    adj_p = _prep(adj, (N_pad_m, N_pad_k), cdt)
    x_p = _prep(x, (N_pad_k, D_pad), cdt)
    gamma_p = _prep(gamma.reshape(1, D), (1, D_pad), jnp.float32)
    beta_p = _prep(beta.reshape(1, D), (1, D_pad), jnp.float32)

    TM = _pick_tm(N_pad_m, m_align)
    TK = _pick_tile(N_pad_k, (2048, 1024, 512, 256, 128))

    vmem_cap = _vmem_capacity_bytes()
    vmem_budget = (vmem_cap * 3) // 4  # leave headroom for Mosaic scratch

    x_bytes = N_pad_k * D_pad * itemsize
    resident = (not force_streamed) and x_bytes <= min(8 << 20, vmem_budget // 4)

    out_itemsize = jnp.dtype(x.dtype).itemsize
    needed = (2 * TM * TK * itemsize             # adj tile, double-buffered
              + 2 * TM * D_pad * out_itemsize    # out tile, double-buffered
              + TM * D_pad * 4                   # f32 accumulator scratch
              + 4 * D_pad * 4)                   # gamma / beta
    needed += x_bytes if resident else 2 * (TK + TM) * D_pad * itemsize
    vmem_limit = int(min(max(needed + (4 << 20), 32 << 20), vmem_budget))

    grid = (N_pad_m // TM, N_pad_k // TK)

    if resident:
        kernel = functools.partial(gnn_kernel_resident, d_true=D, tm=TM, tk=TK)
        in_specs = [
            pl.BlockSpec((TM, TK), lambda i, k: (i, k)),           # adj tile
            pl.BlockSpec((N_pad_k, D_pad), lambda i, k: (0, 0)),   # x resident
            pl.BlockSpec((1, D_pad), lambda i, k: (0, 0)),         # gamma
            pl.BlockSpec((1, D_pad), lambda i, k: (0, 0)),         # beta
        ]
        operands = (adj_p, x_p, gamma_p, beta_p)
    else:
        kernel = functools.partial(gnn_kernel_streamed, d_true=D)
        in_specs = [
            pl.BlockSpec((TM, TK), lambda i, k: (i, k)),           # adj tile
            pl.BlockSpec((TK, D_pad), lambda i, k: (k, 0)),        # x (K-indexed)
            pl.BlockSpec((TM, D_pad), lambda i, k: (i, 0)),        # x (row-indexed)
            pl.BlockSpec((1, D_pad), lambda i, k: (0, 0)),         # gamma
            pl.BlockSpec((1, D_pad), lambda i, k: (0, 0)),         # beta
        ]
        operands = (adj_p, x_p, x_p, gamma_p, beta_p)

    out = pl.pallas_call(
        kernel,
        out_shape=jax.ShapeDtypeStruct((N_pad_m, D_pad), x.dtype),
        grid_spec=pltpu.PrefetchScalarGridSpec(
            num_scalar_prefetch=0,
            grid=grid,
            in_specs=in_specs,
            out_specs=pl.BlockSpec((TM, D_pad), lambda i, k: (i, 0)),
            scratch_shapes=[pltpu.VMEM((TM, D_pad), jnp.float32)],
        ),
        compiler_params=pltpu.CompilerParams(
            dimension_semantics=("parallel", "arbitrary"),
            vmem_limit_bytes=vmem_limit,
        ),
    )(*operands)

    return out[:N, :D]


def reference(x, adj, gamma, beta):
    h = adj @ x + x
    mean = jnp.mean(h, axis=-1, keepdims=True)
    var = jnp.mean((h - mean) ** 2, axis=-1, keepdims=True)
    return (h - mean) / jnp.sqrt(var + EPS) * gamma + beta


if __name__ == "__main__":
    key = jax.random.PRNGKey(0)
    k1, k2 = jax.random.split(key)

    N, D = 8, 32                     # nodes=8, feature dim=32
    x = jax.random.normal(k1, (N, D), dtype=jnp.float32)

    # Sparse-ish adjacency stored densely (~30% nonzeros), deterministic.
    a = jax.random.uniform(k2, (N, N), dtype=jnp.float32)
    adj = jnp.where(a > 0.7, a, 0.0)

    # nn.LayerNorm(dim) default init: weight = ones, bias = zeros
    gamma = jnp.ones((D,), dtype=jnp.float32)
    beta = jnp.zeros((D,), dtype=jnp.float32)

    ref = reference(x, adj, gamma, beta)

    # 1) f32, resident-x path (default).
    out = jax.block_until_ready(lightweight_gnn(x, adj, gamma, beta))
    assert out.shape == (N, D)
    assert jnp.allclose(out, ref, atol=1e-4, rtol=1e-4), "f32 resident mismatch"

    # 2) streamed fallback path (same numerics, exercises the large-graph path).
    out_s = jax.block_until_ready(
        lightweight_gnn(x, adj, gamma, beta, force_streamed=True))
    assert jnp.allclose(out_s, ref, atol=1e-4, rtol=1e-4), "f32 streamed mismatch"

    # 3) bf16 adj/x streaming (halves dominant HBM traffic), f32 accumulation.
    out_bf = jax.block_until_ready(
        lightweight_gnn(x, adj, gamma, beta, compute_dtype=jnp.bfloat16))
    assert jnp.allclose(out_bf, ref, atol=5e-2, rtol=5e-2), "bf16 mismatch"

    print("KERNEL_OK")
</pallas_src>

<mosaic_0001>
module attributes {stable_mosaic.version = 11 : i64} {
  func.func @gnn_kernel_resident(%arg0: i32, %arg1: i32, %arg2: memref<8x128xf32, #tpu.memory_space<vmem>>, %arg3: memref<128x128xf32, #tpu.memory_space<vmem>>, %arg4: memref<1x128xf32, #tpu.memory_space<vmem>>, %arg5: memref<1x128xf32, #tpu.memory_space<vmem>>, %arg6: memref<8x128xf32, #tpu.memory_space<vmem>>, %arg7: memref<8x128xf32, #tpu.memory_space<vmem>>) attributes {dimension_semantics = [#tpu.dimension_semantics<parallel>, #tpu.dimension_semantics<arbitrary>], iteration_bounds = array<i64: 1, 1>, scalar_prefetch = 0 : i64, scratch_operands = 1 : i64, tpu.core_type = #tpu.core_type<tc>, window_params = [{transform_indices = @transform_0, window_bounds = array<i64: 8, 128>}, {pipeline_mode = #tpu.pipeline_mode<synchronous>, transform_indices = @transform_1, window_bounds = array<i64: 128, 128>}, {pipeline_mode = #tpu.pipeline_mode<synchronous>, transform_indices = @transform_2, window_bounds = array<i64: 1, 128>}, {pipeline_mode = #tpu.pipeline_mode<synchronous>, transform_indices = @transform_3, window_bounds = array<i64: 1, 128>}, {transform_indices = @transform_4, window_bounds = array<i64: 8, 128>}]} {
    %c0_i32 = arith.constant 0 : i32
    %0 = arith.cmpi eq, %arg1, %c0_i32 : i32
    %1 = arith.extui %0 : i1 to i32
    %c0_i32_0 = arith.constant 0 : i32
    %2 = arith.cmpi ne, %1, %c0_i32_0 : i32
    scf.if %2 {
      %c8_i32 = arith.constant 8 : i32
      %15 = arith.muli %arg0, %c8_i32 : i32
      %16 = tpu.assume_multiple %15, 8 : i32
      %17 = arith.index_cast %16 : i32 to index
      %c0_9 = arith.constant 0 : index
      %18 = vector.load %arg3[%17, %c0_9] : memref<128x128xf32, #tpu.memory_space<vmem>>, vector<8x128xf32>
      %c0_10 = arith.constant 0 : index
      %c0_11 = arith.constant 0 : index
      %19 = vector.load %arg7[%c0_10, %c0_11] : memref<8x128xf32, #tpu.memory_space<vmem>>, vector<8x128xf32>
      tpu.vector_store %arg7[%c0_10, %c0_11], %18 {strides = array<i32>} : memref<8x128xf32, #tpu.memory_space<vmem>>, vector<8x128xf32>,
    } else {
    }
    %c128_i32 = arith.constant 128 : i32
    %3 = arith.muli %arg1, %c128_i32 : i32
    %4 = tpu.assume_multiple %3, 128 : i32
    %c0 = arith.constant 0 : index
    %c0_1 = arith.constant 0 : index
    %5 = vector.load %arg7[%c0, %c0_1] : memref<8x128xf32, #tpu.memory_space<vmem>>, vector<8x128xf32>
    %c0_2 = arith.constant 0 : index
    %c0_3 = arith.constant 0 : index
    %6 = vector.load %arg2[%c0_2, %c0_3] : memref<8x128xf32, #tpu.memory_space<vmem>>, vector<8x128xf32>
    %7 = arith.index_cast %4 : i32 to index
    %c0_4 = arith.constant 0 : index
    %8 = vector.load %arg3[%7, %c0_4] : memref<128x128xf32, #tpu.memory_space<vmem>>, vector<128x128xf32>
    %cst = arith.constant dense<0.000000e+00> : vector<8x128xf32>
    %9 = tpu.matmul %6, %8, %cst {dimension_numbers = #tpu.dot_dimension_numbers<[1], [0], [0], [1], [0, 0, 1, 1], [], []>} : vector<8x128xf32>, vector<128x128xf32>, vector<8x128xf32> -> vector<8x128xf32>
    %10 = arith.addf %5, %9 : vector<8x128xf32>
    %c0_5 = arith.constant 0 : index
    %c0_6 = arith.constant 0 : index
    %11 = vector.load %arg7[%c0_5, %c0_6] : memref<8x128xf32, #tpu.memory_space<vmem>>, vector<8x128xf32>
    tpu.vector_store %arg7[%c0_5, %c0_6], %10 {strides = array<i32>} : memref<8x128xf32, #tpu.memory_space<vmem>>, vector<8x128xf32>,
    %c0_i32_7 = arith.constant 0 : i32
    %12 = arith.cmpi eq, %arg1, %c0_i32_7 : i32
    %13 = arith.extui %12 : i1 to i32
    %c0_i32_8 = arith.constant 0 : i32
    %14 = arith.cmpi ne, %13, %c0_i32_8 : i32
    scf.if %14 {
      %c0_9 = arith.constant 0 : index
      %c0_10 = arith.constant 0 : index
      %15 = vector.load %arg7[%c0_9, %c0_10] : memref<8x128xf32, #tpu.memory_space<vmem>>, vector<8x128xf32>
      %c0_11 = arith.constant 0 : index
      %c0_12 = arith.constant 0 : index
      %16 = vector.load %arg4[%c0_11, %c0_12] : memref<1x128xf32, #tpu.memory_space<vmem>>, vector<1x128xf32>
      %c0_13 = arith.constant 0 : index
      %c0_14 = arith.constant 0 : index
      %17 = vector.load %arg5[%c0_13, %c0_14] : memref<1x128xf32, #tpu.memory_space<vmem>>, vector<1x128xf32>
      %cst_15 = arith.constant dense<0.000000e+00> : vector<8xf32>
      %18 = vector.multi_reduction <add>, %15, %cst_15 [1] : vector<8x128xf32> to vector<8xf32>
      %19 = vector.shape_cast %18 : vector<8xf32> to vector<8x1xf32>
      %cst_16 = arith.constant 3.125000e-02 : f32
      %20 = vector.broadcast %cst_16 : f32 to vector<8x1xf32>
      %21 = arith.mulf %19, %20 : vector<8x1xf32>
      %22 = arith.mulf %15, %15 : vector<8x128xf32>
      %cst_17 = arith.constant dense<0.000000e+00> : vector<8xf32>
      %23 = vector.multi_reduction <add>, %22, %cst_17 [1] : vector<8x128xf32> to vector<8xf32>
      %24 = vector.shape_cast %23 : vector<8xf32> to vector<8x1xf32>
      %cst_18 = arith.constant 3.125000e-02 : f32
      %25 = vector.broadcast %cst_18 : f32 to vector<8x1xf32>
      %26 = arith.mulf %24, %25 : vector<8x1xf32>
      %27 = arith.mulf %21, %21 : vector<8x1xf32>
      %28 = arith.subf %26, %27 : vector<8x1xf32>
      %cst_19 = arith.constant 0.000000e+00 : f32
      %29 = vector.broadcast %cst_19 : f32 to vector<8x1xf32>
      %30 = arith.maximumf %28, %29 : vector<8x1xf32>
      %cst_20 = arith.constant 9.99999974E-6 : f32
      %31 = vector.broadcast %cst_20 : f32 to vector<8x1xf32>
      %32 = arith.addf %30, %31 : vector<8x1xf32>
      %33 = math.rsqrt %32 : vector<8x1xf32>
      %34 = vector.broadcast %21 : vector<8x1xf32> to vector<8x128xf32>
      %35 = arith.subf %15, %34 : vector<8x128xf32>
      %36 = vector.broadcast %33 : vector<8x1xf32> to vector<8x128xf32>
      %37 = arith.mulf %35, %36 : vector<8x128xf32>
      %38 = vector.broadcast %16 : vector<1x128xf32> to vector<8x128xf32>
      %39 = arith.mulf %37, %38 : vector<8x128xf32>
      %40 = vector.broadcast %17 : vector<1x128xf32> to vector<8x128xf32>
      %41 = arith.addf %39, %40 : vector<8x128xf32>
      %c0_21 = arith.constant 0 : index
      %c0_22 = arith.constant 0 : index
      %42 = vector.load %arg6[%c0_21, %c0_22] : memref<8x128xf32, #tpu.memory_space<vmem>>, vector<8x128xf32>
      tpu.vector_store %arg6[%c0_21, %c0_22], %41 {strides = array<i32>} : memref<8x128xf32, #tpu.memory_space<vmem>>, vector<8x128xf32>,
    } else {
    }
    return
  }
  func.func @transform_0(%arg0: i32, %arg1: i32) -> (i32, i32) {
    %c0_i32 = arith.constant 0 : i32
    return %arg0, %arg1 : i32, i32
  }
  func.func @transform_1(%arg0: i32, %arg1: i32) -> (i32, i32) {
    %c0_i32 = arith.constant 0 : i32
    %c0_i32_0 = arith.constant 0 : i32
    %c0_i32_1 = arith.constant 0 : i32
    return %c0_i32, %c0_i32_0 : i32, i32
  }
  func.func @transform_2(%arg0: i32, %arg1: i32) -> (i32, i32) {
    %c0_i32 = arith.constant 0 : i32
    %c0_i32_0 = arith.constant 0 : i32
    %c0_i32_1 = arith.constant 0 : i32
    return %c0_i32, %c0_i32_0 : i32, i32
  }
  func.func @transform_3(%arg0: i32, %arg1: i32) -> (i32, i32) {
    %c0_i32 = arith.constant 0 : i32
    %c0_i32_0 = arith.constant 0 : i32
    %c0_i32_1 = arith.constant 0 : i32
    return %c0_i32, %c0_i32_0 : i32, i32
  }
  func.func @transform_4(%arg0: i32, %arg1: i32) -> (i32, i32) {
    %c0_i32 = arith.constant 0 : i32
    %c0_i32_0 = arith.constant 0 : i32
    return %arg0, %c0_i32 : i32, i32
  }
}

</mosaic_0001>

<bundles_post_ra>
// kernel: tpu_custom_call.1
= control target key start
LH: loop header
LB: loop body
LE: loop exit
PB: predicated region body
PF: predicated region fallthrough
CT: control target
= control target key end

     0   :  { %9 = vsyncpa [#allocation4], 0  ;;  %s437_s0 = inlined_call_operand.hbm [shape: f32[8,128], index: 0, kind: input, shape index: {}]   ;;  %s438_s1 = inlined_call_operand.hbm [shape: f32[128,128], index: 1, kind: input, shape index: {}]   ;;  %s439_s2 = inlined_call_operand.vmem [shape: f32[1,128], index: 2, kind: input, shape index: {}]   ;;  %s440_s3 = inlined_call_operand.vmem [shape: f32[1,128], index: 3, kind: input, shape index: {}]   ;;  %s441_s4 = inlined_call_operand.hbm [shape: f32[8,128], index: 4, kind: output, shape index: {}]  }
   0x1   :  { %10 = vsyncpa [#allocation7], 0 }
   0x2   :  { %11 = vsyncpa [#allocation5], 0  ;;  %s355_s15 = smov [#allocation3]   ;;  %s356_s17 = smov [#allocation6]  }
   0x3   :  { %s18_s16 = sshll.u32 %s355_s15, 4  ;;  %s27_s18 = sshll.u32 %s356_s17, 4  ;;  %s19_s16 = int_to_ptr.vmem [resolvable:$true] %s18_s16  ;;  %s388_s18 = int_to_ptr.vmem [resolvable:$true] %s27_s18 }
   0x4   :  { %s283_s21 = scalar_lea.hbm %s437_s0, 128 }
   0x5   :  { %p284_p0 = scmp.ne.s32.totalorder %s437_s0, %s283_s21  ;;  %p287_p1 = scmp.lt.u32.totalorder %s283_s21, %s437_s0 }
   0x7   :  { %p289_p2 = pnand %p287_p1, %p284_p0 }
   0x9   :  { %292 = shalt.err (!%p289_p2)
}
   0xa   :  { %s293_s26 = scalar_lea.vmem %s19_s16, 128  ;;  %p298_p4 = scmp.lt.s32.totalorder %s19_s16, %s19_s16 }
   0xb   :  { %p294_p3 = scmp.ne.s32.totalorder %s19_s16, %s293_s26  ;;  %p299_p5 = scmp.lt.s32.totalorder %s293_s26, %s293_s26 }
   0xd   :  { %p300_p6 = por %p299_p5, %p298_p4 }
   0xf   :  { %p301_p7 = pnand %p300_p6, %p294_p3 }
  0x11   :  { %304 = shalt.err (!%p301_p7)
}
  0x12   :  { %21 = dma.hbm_to_vmem [thread:$0]  %s437_s0, 128, %s19_s16, [#allocation4]  }
  0x13   :  { %s305_s5 = scalar_lea.hbm %s438_s1, 2048 }
  0x14   :  { %p306_p8 = scmp.ne.s32.totalorder %s438_s1, %s305_s5  ;;  %p309_p9 = scmp.lt.u32.totalorder %s305_s5, %s438_s1 }
  0x16   :  { %p311_p10 = pnand %p309_p9, %p306_p8 }
  0x18   :  { %314 = shalt.err (!%p311_p10)
}
  0x19   :  { %s315_s10 = scalar_lea.vmem %s388_s18, 2048  ;;  %p320_p12 = scmp.lt.s32.totalorder %s388_s18, %s388_s18 }
  0x1a   :  { %p316_p11 = scmp.ne.s32.totalorder %s388_s18, %s315_s10  ;;  %p321_p13 = scmp.lt.s32.totalorder %s315_s10, %s315_s10 }
  0x1c   :  { %p322_p0 = por %p321_p13, %p320_p12 }
  0x1e   :  { %p323_p1 = pnand %p322_p0, %p316_p11 }
  0x20   :  { %326 = shalt.err (!%p323_p1)
}
  0x21   :  { %s357_s0 = smov 128   ;;  %s358_s11 = smov 8  }
  0x22   :  { %33 = dma.hbm_to_vmem [thread:$0]  %s438_s1, 2048, %s388_s18, [#allocation7], %s357_s0, %s357_s0, %s358_s11  }
  0x23   :  { %349 = dma.done.wait [#allocation4], 128  }
  0x24   :  { %350 = vsyncadd [#allocation4], 4294967168 }
  0x25   :  { %351 = dma.done.wait [#allocation7], 2048  }
  0x26   :  { %352 = vsyncadd [#allocation7], 4294965248  ;;  %v359_v0 = vmov 0.0|0.0   ;;  %vm360_vm0 = vmmov 0   ;;  %v361_v1 = vmov 0.0   ;;  %v56_v2 = vld [vmem:[#allocation6] sm:$0xff] }
  0x27   :  { %249 = vmatprep.subr.bf16.mxu0 %v359_v0  ;;  %246 = vmatprep.mubr.msk.f32.mxu0 %vm360_vm0, %v361_v1  ;;  %v57_v3 = vld [vmem:[#allocation6 + $0x8] sm:$0xff]  ;;  %v58_v4 = vld [vmem:[#allocation6 + $0x10] sm:$0xff]  ;;  %v59_v6 = vld [vmem:[#allocation6 + $0x18] sm:$0xff]  ;;  %s362_s17 = smov [#allocation8]  }
  0x28   :  { %v250_v5 = vpack.c.bf16 %v57_v3, %v56_v2  ;;  %v253_v7 = vpack.c.bf16 %v59_v6, %v58_v4  ;;  %v60_v8 = vld [vmem:[#allocation6 + $0x20] sm:$0xff]  ;;  %v61_v9 = vld [vmem:[#allocation6 + $0x28] sm:$0xff]  ;;  %v62_v11 = vld [vmem:[#allocation6 + $0x30] sm:$0xff]  ;;  %s185_s18 = sshll.u32 %s362_s17, 4  ;;  %s186_s18 = int_to_ptr.vmem [resolvable:$true] %s185_s18 }
  0x29   :  { %v256_v10 = vpack.c.bf16 %v61_v9, %v60_v8  ;;  %v63_v12 = vld [vmem:[#allocation6 + $0x38] sm:$0xff]  ;;  %v64_v14 = vld [vmem:[#allocation6 + $0x40] sm:$0xff]  ;;  %v65_v15 = vld [vmem:[#allocation6 + $0x48] sm:$0xff]  ;;  %s327_s19 = scalar_lea.vmem %s186_s18, 128  ;;  %p332_p3 = scmp.lt.s32.totalorder %s186_s18, %s186_s18 }
  0x2a   :  { %251 = vmatpush3.bf16.msra.mxu0 %v250_v5  ;;  %v259_v13 = vpack.c.bf16 %v63_v12, %v62_v11  ;;  %v262_v16 = vpack.c.bf16 %v65_v15, %v64_v14  ;;  %v66_v17 = vld [vmem:[#allocation6 + $0x50] sm:$0xff]  ;;  %v67_v18 = vld [vmem:[#allocation6 + $0x58] sm:$0xff]  ;;  %v68_v20 = vld [vmem:[#allocation6 + $0x60] sm:$0xff]  ;;  %p328_p2 = scmp.ne.s32.totalorder %s186_s18, %s327_s19  ;;  %p333_p4 = scmp.lt.s32.totalorder %s327_s19, %s327_s19 }
  0x2b   :  { %252 = vmatprep.subr.bf16.mxu0 %v359_v0  ;;  %v265_v19 = vpack.c.bf16 %v67_v18, %v66_v17  ;;  %v69_v21 = vld [vmem:[#allocation6 + $0x68] sm:$0xff]  ;;  %v70_v23 = vld [vmem:[#allocation6 + $0x70] sm:$0xff]  ;;  %v71_v24 = vld [vmem:[#allocation6 + $0x78] sm:$0xff] }
  0x2c   :  { %v268_v22 = vpack.c.bf16 %v69_v21, %v68_v20  ;;  %v271_v25 = vpack.c.bf16 %v71_v24, %v70_v23  ;;  %v54_v26 = vld [vmem:[#allocation3] sm:$0xff]  ;;  %p334_p5 = por %p333_p4, %p332_p3 }
  0x2d   :  { %v195_v41 = vld [vmem:[%s439_s2] ss:$0 sm:$0xff] }
  0x2e   :  { %254 = vmatpush3.bf16.msra.mxu0 %v253_v7  ;;  %v196_v43 = vld [vmem:[%s440_s3] ss:$0 sm:$0xff]  ;;  %p335_p6 = pnand %p334_p5, %p328_p2 }
  0x2f   :  { %255 = vmatprep.subr.bf16.mxu0 %v359_v0 }
  0x32   :  { %257 = vmatpush3.bf16.msra.mxu0 %v256_v10 }
  0x33   :  { %258 = vmatprep.subr.bf16.mxu0 %v359_v0 }
  0x36   :  { %260 = vmatpush3.bf16.msra.mxu0 %v259_v13 }
  0x37   :  { %261 = vmatprep.subr.bf16.mxu0 %v359_v0 }
  0x3a   :  { %263 = vmatpush3.bf16.msra.mxu0 %v262_v16 }
  0x3b   :  { %264 = vmatprep.subr.bf16.mxu0 %v359_v0 }
  0x3e   :  { %266 = vmatpush3.bf16.msra.mxu0 %v265_v19 }
  0x3f   :  { %267 = vmatprep.subr.bf16.mxu0 %v359_v0 }
  0x42   :  { %269 = vmatpush3.bf16.msra.mxu0 %v268_v22 }
  0x43   :  { %270 = vmatprep.subr.bf16.mxu0 %v359_v0 }
  0x46   :  { %272 = vmatpush3.bf16.msra.mxu0 %v271_v25 }
  0x49   :  { %247 = vmatmul.mubr.f32.vlgmr.msra.gmra.mrb[0].mxu0 %v54_v26 }
 0x11c   :  { %v138_v27 = vpop.f32.mrb[0].mxu0 }
 0x11d   :  { %v142_v28 = vadd.f32 %v138_v27, %v56_v2  ;;  %v248_v29 = vpop.f32.mrb[1].mxu0 }
 0x11f   :  { %150 = vadd.xlane.f32.xlu0 %v142_v28  ;;  %v153_v30 = vmul.f32 %v142_v28, %v142_v28 }
 0x123   :  { %154 = vadd.xlane.f32.xlu0 %v153_v30 }
 0x1ac   :  { %v151_v31 = vpop.xlane.xlu0 %150 }
 0x1ad   :  { %v152_v32 = vmul.f32 0.03125, %v151_v31 }
 0x1af   :  { %v157_v34 = vmul.f32 %v152_v32, %v152_v32  ;;  %v162_v39 = vsub.f32 %v142_v28, %v152_v32 }
 0x1b0   :  { %v155_v33 = vpop.xlane.xlu0 %154 }
 0x1b1   :  { %v156_v35 = vmul.f32 0.03125, %v155_v33 }
 0x1b3   :  { %v158_v36 = vsub.f32 %v156_v35, %v157_v34 }
 0x1b5   :  { %v159_v37 = vmax.f32 %v158_v36, 0.0 }
 0x1b7   :  { %v160_v38 = vadd.f32 1e-05, %v159_v37 }
 0x1b9   :  { %281 = vrsqrt.f32 %v160_v38 }
 0x1c3   :  { %v282_v40 = vpop.eup %281 }
 0x1c4   :  { %v163_v42 = vmul.f32 %v282_v40, %v162_v39 }
 0x1c6   :  { %v170_v44 = vmul.f32 %v195_v41, %v163_v42 }
 0x1c8   :  { %v177_v45 = vadd.f32 %v196_v43, %v170_v44 }
 0x1ca   :  { %178 = vst [vmem:[#allocation8] sm:$0xff] %v177_v45 }
 0x1cb   :  { %338 = shalt.err (!%p335_p6)
}
 0x1cc   :  { %s339_s21 = scalar_lea.hbm %s441_s4, 128 }
 0x1cd   :  { %p340_p7 = scmp.ne.s32.totalorder %s441_s4, %s339_s21  ;;  %p343_p8 = scmp.lt.u32.totalorder %s339_s21, %s441_s4 }
 0x1cf   :  { %p345_p9 = pnand %p343_p8, %p340_p7 }
 0x1d1   :  { %348 = shalt.err (!%p345_p9)
}
 0x1d2   :  { %188 = dma.vmem_to_hbm [thread:$0]  %s186_s18, 128, %s441_s4, [#allocation5]  }
 0x1d3   :  { %353 = dma.done.wait [#allocation5], 128  }
 0x1d4   :  { %354 = vsyncadd [#allocation5], 4294967168 }
 0x1d5   :  { %192 = vsyncpa [#allocation4], 1 }
 0x1d6   :  { %193 = vsyncpa [#allocation7], 1 }
 0x1d7   :  { %194 = vsyncpa [#allocation5], 1 }

</bundles_post_ra>
